<compile_context>
chip_gen: v5e
topology: v5e:2x2
jax: 0.10.0
libtpu: 0.0.40
codegen_flags: <defaults>
</compile_context>

<pallas_src>
import functools

import jax
import jax.numpy as jnp
from jax import lax
from jax.experimental import pallas as pl
from jax.experimental.pallas import tpu as pltpu


def _round_up(n, m):
    return ((n + m - 1) // m) * m


# ----------------------------------------------------------------------------
# Kernel 1 (inference path): y_pred = sigmoid(x @ W^T + b), batch-tiled grid.
# ----------------------------------------------------------------------------
def _linear_sigmoid_kernel(x_ref, w_ref, b_ref, o_ref, *, bf16_matmul):
    xv = x_ref[...]
    wv = w_ref[...]
    if bf16_matmul:
        # Free ~2x on v6e/v7x MXU at large shapes; keep accumulation + epilogue in f32.
        xv = xv.astype(jnp.bfloat16)
        wv = wv.astype(jnp.bfloat16)
    z = lax.dot_general(
        xv, wv,
        dimension_numbers=(((1,), (1,)), ((), ())),   # contract on input_size: x @ W^T
        preferred_element_type=jnp.float32,
    )
    o_ref[...] = jax.nn.sigmoid(z + b_ref[...]).astype(o_ref.dtype)


# ----------------------------------------------------------------------------
# Kernel 2 (training path): fused linear + sigmoid + cross_entropy(mean).
# PyTorch semantics on the *activated* outputs (as the reference model does):
#   loss = mean_i( logsumexp(y_pred_i) - y_pred_i[y_i] )
# Labels arrive as an int32 (tm, 1) block; the gather is a broadcasted-iota compare
# (pure VPU), so no one-hot matrix ever touches HBM. The batch grid axis is a
# reduction: the (1,1) output block stays resident and acts as the accumulator,
# with pl.when init/finalize and a division by the FULL batch (not per-tile mean).
# ----------------------------------------------------------------------------
def _fused_loss_kernel(x_ref, w_ref, b_ref, y_ref, loss_ref, *,
                       out_dim, batch, tm, bf16_matmul):
    i = pl.program_id(0)

    @pl.when(i == 0)
    def _init():
        loss_ref[...] = jnp.zeros_like(loss_ref)

    xv = x_ref[...]
    wv = w_ref[...]
    if bf16_matmul:
        xv = xv.astype(jnp.bfloat16)
        wv = wv.astype(jnp.bfloat16)
    z = lax.dot_general(
        xv, wv,
        dimension_numbers=(((1,), (1,)), ((), ())),
        preferred_element_type=jnp.float32,
    )
    z = jax.nn.sigmoid(z + b_ref[...])                       # (tm, c_pad) f32

    c_pad = z.shape[-1]
    col = lax.broadcasted_iota(jnp.int32, (tm, c_pad), 1)
    col_valid = col < out_dim                                 # mask padded classes
    col_valid_f = col_valid.astype(jnp.float32)
    label_mask = (col == y_ref[...]).astype(jnp.float32)      # (tm, c_pad)

    # Numerically-stable logsumexp over valid classes only; keep everything (tm, 1) 2-D.
    z_for_max = jnp.where(col_valid, z, jnp.float32(-1e30))
    m = jnp.max(z_for_max, axis=-1, keepdims=True)            # (tm, 1)
    p = jnp.exp(z - m) * col_valid_f
    lse = m + jnp.log(jnp.sum(p, axis=-1, keepdims=True))     # (tm, 1)
    picked = jnp.sum(z * label_mask, axis=-1, keepdims=True)  # (tm, 1)

    # Mask batch-padding rows so they contribute nothing to the global sum.
    row = lax.broadcasted_iota(jnp.int32, (tm, 1), 0) + i * tm
    row_valid = (row < batch).astype(jnp.float32)

    loss_ref[...] += jnp.sum((lse - picked) * row_valid, keepdims=True)

    @pl.when(i == pl.num_programs(0) - 1)
    def _finalize():
        loss_ref[...] = loss_ref[...] * jnp.float32(1.0 / batch)


# ----------------------------------------------------------------------------
# Wrapper mirroring TorchModel.forward(x, y=None)
# ----------------------------------------------------------------------------
def torch_model_forward(x, w, b, y=None, *, bf16_matmul=False):
    """x: (B, input_size) f32; w: (output_size, input_size) f32; b: (output_size,) f32.
    Returns sigmoid(linear(x)) if y is None, else cross_entropy(sigmoid(linear(x)), y)."""
    batch, in_dim = x.shape
    out_dim = w.shape[0]

    # Lane-dense class dim (multiple of 128); batch tile sized for VMEM double-buffering
    # on all generations (tiny here; 256 rows x in_dim f32 at production sizes).
    c_pad = _round_up(out_dim, 128)
    tm = batch if batch <= 256 else 256
    tm = _round_up(tm, 8)
    b_pad = _round_up(batch, tm)

    # Zero-pad parameters once (in a real model this happens at init, not per call).
    w_p = jnp.zeros((c_pad, in_dim), jnp.float32).at[:out_dim, :].set(w)
    b_p = jnp.zeros((1, c_pad), jnp.float32).at[0, :out_dim].set(b)
    x_p = x if b_pad == batch else jnp.pad(x, ((0, b_pad - batch), (0, 0)))

    grid = (b_pad // tm,)
    vmem_limit = 32 * 1024 * 1024  # safe on v5e/v6e (128 MiB) and v7x (64 MiB physical)

    if y is None:
        kernel = functools.partial(_linear_sigmoid_kernel, bf16_matmul=bf16_matmul)
        out = pl.pallas_call(
            kernel,
            out_shape=jax.ShapeDtypeStruct((b_pad, c_pad), jnp.float32),
            grid=grid,
            in_specs=[
                pl.BlockSpec((tm, in_dim), lambda i: (i, 0)),     # x tile
                pl.BlockSpec((c_pad, in_dim), lambda i: (0, 0)),  # full weight, resident
                pl.BlockSpec((1, c_pad), lambda i: (0, 0)),       # bias, resident
            ],
            out_specs=pl.BlockSpec((tm, c_pad), lambda i: (i, 0)),
            compiler_params=pltpu.CompilerParams(
                dimension_semantics=("parallel",),   # shard batch tiles across TCs (v7x)
                vmem_limit_bytes=vmem_limit,
            ),
        )(x_p, w_p, b_p)
        return out[:batch, :out_dim]

    # Training path: single fused kernel — y_pred never round-trips through HBM.
    y_p = jnp.asarray(y, jnp.int32).reshape(batch, 1)
    if b_pad != batch:
        y_p = jnp.pad(y_p, ((0, b_pad - batch), (0, 0)))

    kernel = functools.partial(
        _fused_loss_kernel,
        out_dim=out_dim, batch=batch, tm=tm, bf16_matmul=bf16_matmul,
    )
    loss = pl.pallas_call(
        kernel,
        out_shape=jax.ShapeDtypeStruct((1, 1), jnp.float32),
        grid=grid,
        in_specs=[
            pl.BlockSpec((tm, in_dim), lambda i: (i, 0)),
            pl.BlockSpec((c_pad, in_dim), lambda i: (0, 0)),
            pl.BlockSpec((1, c_pad), lambda i: (0, 0)),
            pl.BlockSpec((tm, 1), lambda i: (i, 0)),              # int32 labels
        ],
        out_specs=pl.BlockSpec((1, 1), lambda i: (0, 0)),         # resident accumulator
        compiler_params=pltpu.CompilerParams(
            dimension_semantics=("arbitrary",),  # batch axis is a reduction here
            vmem_limit_bytes=vmem_limit,
        ),
    )(x_p, w_p, b_p, y_p)
    return loss[0, 0]


if __name__ == "__main__":
    # Small shapes consistent with the module: batch=8, input_size=32, output_size=8
    batch, input_size, output_size = 8, 32, 8

    key = jax.random.PRNGKey(0)
    kx, kw, kb, ky = jax.random.split(key, 4)

    x = jax.random.normal(kx, (batch, input_size), dtype=jnp.float32)
    bound = 1.0 / (input_size ** 0.5)
    w = jax.random.uniform(kw, (output_size, input_size), jnp.float32, -bound, bound)
    b = jax.random.uniform(kb, (output_size,), jnp.float32, -bound, bound)
    y = jax.random.randint(ky, (batch,), 0, output_size)

    # inference path (y=None)
    y_pred = torch_model_forward(x, w, b)
    jax.block_until_ready(y_pred)

    # training path (fused cross-entropy loss)
    loss = torch_model_forward(x, w, b, y)
    jax.block_until_ready(loss)

    # sanity check against pure-JAX reference (f32 everywhere; bf16 matmul is opt-in)
    ref_pred = jax.nn.sigmoid(x @ w.T + b)
    ref_loss = jnp.mean(
        jax.scipy.special.logsumexp(ref_pred, axis=-1)
        - ref_pred[jnp.arange(batch), y]
    )
    assert jnp.allclose(y_pred, ref_pred, atol=1e-5), "pred mismatch"
    assert jnp.allclose(loss, ref_loss, atol=1e-5), "loss mismatch"

    print("KERNEL_OK")
</pallas_src>

<mosaic_0001>
module attributes {stable_mosaic.version = 11 : i64} {
  func.func @_linear_sigmoid_kernel(%arg0: i32, %arg1: memref<8x32xf32, #tpu.memory_space<vmem>>, %arg2: memref<128x32xf32, #tpu.memory_space<vmem>>, %arg3: memref<1x128xf32, #tpu.memory_space<vmem>>, %arg4: memref<8x128xf32, #tpu.memory_space<vmem>>) attributes {dimension_semantics = [#tpu.dimension_semantics<parallel>], iteration_bounds = array<i64: 1>, scalar_prefetch = 0 : i64, scratch_operands = 0 : i64, tpu.core_type = #tpu.core_type<tc>, window_params = [{transform_indices = @transform_0, window_bounds = array<i64: 8, 32>}, {pipeline_mode = #tpu.pipeline_mode<synchronous>, transform_indices = @transform_1, window_bounds = array<i64: 128, 32>}, {pipeline_mode = #tpu.pipeline_mode<synchronous>, transform_indices = @transform_2, window_bounds = array<i64: 1, 128>}, {transform_indices = @transform_3, window_bounds = array<i64: 8, 128>}]} {
    %c0 = arith.constant 0 : index
    %c0_0 = arith.constant 0 : index
    %0 = vector.load %arg1[%c0, %c0_0] : memref<8x32xf32, #tpu.memory_space<vmem>>, vector<8x32xf32>
    %c0_1 = arith.constant 0 : index
    %c0_2 = arith.constant 0 : index
    %1 = vector.load %arg2[%c0_1, %c0_2] : memref<128x32xf32, #tpu.memory_space<vmem>>, vector<128x32xf32>
    %cst = arith.constant dense<0.000000e+00> : vector<8x128xf32>
    %2 = tpu.matmul %0, %1, %cst {dimension_numbers = #tpu.dot_dimension_numbers<[1], [1], [0], [0], [0, 0, 1, 0], [], []>} : vector<8x32xf32>, vector<128x32xf32>, vector<8x128xf32> -> vector<8x128xf32>
    %c0_3 = arith.constant 0 : index
    %c0_4 = arith.constant 0 : index
    %3 = vector.load %arg3[%c0_3, %c0_4] : memref<1x128xf32, #tpu.memory_space<vmem>>, vector<1x128xf32>
    %4 = vector.broadcast %3 : vector<1x128xf32> to vector<8x128xf32>
    %5 = arith.addf %2, %4 : vector<8x128xf32>
    %6 = arith.negf %5 : vector<8x128xf32>
    %7 = math.exp %6 : vector<8x128xf32>
    %cst_5 = arith.constant 1.000000e+00 : f32
    %8 = vector.broadcast %cst_5 : f32 to vector<8x128xf32>
    %9 = arith.addf %8, %7 : vector<8x128xf32>
    %10 = arith.divf %8, %9 : vector<8x128xf32>
    %c0_6 = arith.constant 0 : index
    %c0_7 = arith.constant 0 : index
    %11 = vector.load %arg4[%c0_6, %c0_7] : memref<8x128xf32, #tpu.memory_space<vmem>>, vector<8x128xf32>
    tpu.vector_store %arg4[%c0_6, %c0_7], %10 {strides = array<i32>} : memref<8x128xf32, #tpu.memory_space<vmem>>, vector<8x128xf32>,
    return
  }
  func.func @transform_0(%arg0: i32) -> (i32, i32) {
    %c0_i32 = arith.constant 0 : i32
    %c0_i32_0 = arith.constant 0 : i32
    return %arg0, %c0_i32 : i32, i32
  }
  func.func @transform_1(%arg0: i32) -> (i32, i32) {
    %c0_i32 = arith.constant 0 : i32
    %c0_i32_0 = arith.constant 0 : i32
    %c0_i32_1 = arith.constant 0 : i32
    return %c0_i32, %c0_i32_0 : i32, i32
  }
  func.func @transform_2(%arg0: i32) -> (i32, i32) {
    %c0_i32 = arith.constant 0 : i32
    %c0_i32_0 = arith.constant 0 : i32
    %c0_i32_1 = arith.constant 0 : i32
    return %c0_i32, %c0_i32_0 : i32, i32
  }
  func.func @transform_3(%arg0: i32) -> (i32, i32) {
    %c0_i32 = arith.constant 0 : i32
    %c0_i32_0 = arith.constant 0 : i32
    return %arg0, %c0_i32 : i32, i32
  }
}

</mosaic_0001>

<bundles_post_ra>
// kernel: tpu_custom_call.1
= control target key start
LH: loop header
LB: loop body
LE: loop exit
PB: predicated region body
PF: predicated region fallthrough
CT: control target
= control target key end

     0   :  { %vm36_vm0 = vcmask 261120   ;;  %s289_s0 = inlined_call_operand.vmem [shape: f32[8,32], index: 0, kind: input, shape index: {}]   ;;  %s290_s1 = inlined_call_operand.vmem [shape: f32[128,32], index: 1, kind: input, shape index: {}]   ;;  %s291_s2 = inlined_call_operand.vmem [shape: f32[1,128], index: 2, kind: input, shape index: {}]   ;;  %s292_s3 = inlined_call_operand.hbm [shape: f32[8,128], index: 3, kind: output, shape index: {}]  }
   0x1   :  { %v31_v0 = vld [vmem:[%s290_s1 + $0x78] sm:$0xff]  ;;  %v30_v1 = vld [vmem:[%s290_s1 + $0x70] sm:$0xff] }
   0x2   :  { %144 = vmatpush.xpose.msk.msra.mxu0 %vm36_vm0, %v31_v0 }
   0x3   :  { %8 = vsyncpa [#allocation3], 0  ;;  %v29_v2 = vld [vmem:[%s290_s1 + $0x68] sm:$0xff]  ;;  %v28_v3 = vld [vmem:[%s290_s1 + $0x60] sm:$0xff] }
   0x4   :  { %v27_v4 = vld [vmem:[%s290_s1 + $0x58] sm:$0xff]  ;;  %v26_v5 = vld [vmem:[%s290_s1 + $0x50] sm:$0xff]  ;;  %v25_v6 = vld [vmem:[%s290_s1 + $0x48] sm:$0xff] }
   0x5   :  { %v24_v7 = vld [vmem:[%s290_s1 + $0x40] sm:$0xff]  ;;  %v23_v8 = vld [vmem:[%s290_s1 + $0x38] sm:$0xff]  ;;  %v22_v9 = vld [vmem:[%s290_s1 + $0x30] sm:$0xff] }
   0x6   :  { %145 = vmatpush.xpose.msk.msra.mxu0 %vm36_vm0, %v30_v1  ;;  %v21_v10 = vld [vmem:[%s290_s1 + $0x28] sm:$0xff]  ;;  %v20_v11 = vld [vmem:[%s290_s1 + $0x20] sm:$0xff]  ;;  %v19_v12 = vld [vmem:[%s290_s1 + $0x18] sm:$0xff] }
   0x7   :  { %v18_v13 = vld [vmem:[%s290_s1 + $0x10] sm:$0xff]  ;;  %v17_v14 = vld [vmem:[%s290_s1 + $0x8] sm:$0xff]  ;;  %v16_v15 = vld [vmem:[%s290_s1] sm:$0xff] }
   0x8   :  { %v15_v16 = vld [vmem:[%s289_s0] sm:$0xff]  ;;  %s194_s0 = smov [#allocation2]  }
   0x9   :  { %v163_v17 = vld [vmem:[%s291_s2] ss:$0 sm:$0xff]  ;;  %s133_s1 = sshll.u32 %s194_s0, 4  ;;  %s135_s2 = sshll.u32 %s292_s3, 4  ;;  %s134_s1 = int_to_ptr.vmem [resolvable:$true] %s133_s1  ;;  %s136_s2 = int_to_ptr.hbm [resolvable:$true] %s135_s2 }
   0xa   :  { %146 = vmatpush.xpose.msk.msra.mxu0 %vm36_vm0, %v29_v2 }
   0xe   :  { %147 = vmatpush.xpose.msk.msra.mxu0 %vm36_vm0, %v28_v3 }
  0x12   :  { %148 = vmatpush.xpose.msk.msra.mxu0 %vm36_vm0, %v27_v4 }
  0x16   :  { %149 = vmatpush.xpose.msk.msra.mxu0 %vm36_vm0, %v26_v5 }
  0x1a   :  { %150 = vmatpush.xpose.msk.msra.mxu0 %vm36_vm0, %v25_v6 }
  0x1e   :  { %151 = vmatpush.xpose.msk.msra.mxu0 %vm36_vm0, %v24_v7 }
  0x22   :  { %152 = vmatpush.xpose.msk.msra.mxu0 %vm36_vm0, %v23_v8 }
  0x26   :  { %153 = vmatpush.xpose.msk.msra.mxu0 %vm36_vm0, %v22_v9 }
  0x2a   :  { %154 = vmatpush.xpose.msk.msra.mxu0 %vm36_vm0, %v21_v10 }
  0x2e   :  { %155 = vmatpush.xpose.msk.msra.mxu0 %vm36_vm0, %v20_v11 }
  0x32   :  { %156 = vmatpush.xpose.msk.msra.mxu0 %vm36_vm0, %v19_v12 }
  0x36   :  { %157 = vmatpush.xpose.msk.msra.mxu0 %vm36_vm0, %v18_v13 }
  0x3a   :  { %158 = vmatpush.xpose.msk.msra.mxu0 %vm36_vm0, %v17_v14 }
  0x3e   :  { %159 = vmatpush.xpose.msk.msra.mxu0 %vm36_vm0, %v16_v15 }
  0x41   :  { %160 = vmatmul.msk.f32.vlgmr.msra.gmra.mxu0 %vm36_vm0, %v15_v16 }
  0xbe   :  { %v105_v18 = vpop.f32.mrf.mxu0 }
  0xbf   :  { %v106_v19 = vadd.f32 %v163_v17, %v105_v18 }
  0xc1   :  { %v161_v20 = vmul.f32 -1.442695, %v106_v19 }
  0xc3   :  { %164 = vpow2.f32 %v161_v20 }
  0xc9   :  { %v165_v21 = vpop.eup %164 }
  0xca   :  { %v111_v22 = vadd.f32 1.0, %v165_v21 }
  0xcc   :  { %166 = vrcp.f32 %v111_v22  ;;  %v123_v26 = vand.u32 2147483648, %v111_v22  ;;  %v121_v28 = vand.u32 2147483647, %v111_v22  ;;  %vm117_vm2 = vweird.f32 %v111_v22 }
  0xce   :  { %v124_v30 = vor.u32 1.1754944e-38, %v123_v26  ;;  %vm122_vm4 = vcmp.eq.f32.partialorder %v121_v28, 8.507059e+37 }
  0xd2   :  { %v167_v23 = vpop.eup %166 }
  0xd3   :  { %v113_v24 = vmul.f32 %v167_v23, %v111_v22  ;;  %vm118_vm1 = vweird.f32 %v167_v23 }
  0xd4   :  { %vm119_vm3 = vmor %vm117_vm2, %vm118_vm1 }
  0xd5   :  { %v114_v25 = vsub.f32 1.0, %v113_v24 }
  0xd7   :  { %v115_v27 = vmul.f32 %v167_v23, %v114_v25 }
  0xd9   :  { %v116_v29 = vadd.f32 %v167_v23, %v115_v27 }
  0xdb   :  { %v120_v31 = vsel %vm119_vm3, %v167_v23, %v116_v29 }
  0xdc   :  { %v125_v32 = vsel %vm122_vm4, %v124_v30, %v120_v31 }
  0xdd   :  { %127 = vst [vmem:[#allocation2] sm:$0xff] %v125_v32 }
  0xde   :  { %138 = dma.vmem_to_hbm [thread:$0]  %s134_s1, 128, %s136_s2, [#allocation3]  }
  0xdf   :  { %192 = dma.done.wait [#allocation3], 128  }
  0xe0   :  { %193 = vsyncadd [#allocation3], 4294967168 }
  0xe1   :  { %143 = vsyncpa [#allocation3], 1 }

</bundles_post_ra>
